<compile_context>
chip_gen: v7x
topology: tpu7x:2x2x1
jax: 0.10.0
libtpu: 0.0.40
codegen_flags: <defaults>
</compile_context>

<pallas_src>
import functools

import jax
import jax.numpy as jnp
from jax.experimental import pallas as pl
from jax.experimental.pallas import tpu as pltpu

_LANE = 128
_SUBLANE = 8
_FUSED_WEIGHT_BYTES_LIMIT = 12 * 1024 * 1024  # above this, use the per-layer tiled path


def _round_up(n, m):
    return ((n + m - 1) // m) * m


def _apply_activation(h, activation):
    if activation == "relu":
        return jnp.maximum(h, 0.0)
    if activation == "leaky_relu":
        return jnp.where(h > 0.0, h, 0.01 * h)
    return h  # identity


def _vmem_capacity_bytes():
    try:
        info = pltpu.get_tpu_info()
        cap = getattr(info, "vmem_capacity_bytes", None)
        if cap:
            return int(cap)
    except Exception:
        pass
    return 64 * 1024 * 1024  # conservative: v7x per-TC physical VMEM


def _vmem_limit(working_set_bytes):
    cap = _vmem_capacity_bytes()
    want = int(working_set_bytes) + (4 << 20)  # headroom for Mosaic internal scratch
    return int(max(16 << 20, min(want, int(cap * 0.75))))


def _resident_spec(shape, single_buffer):
    """Full-array, grid-invariant block: fetched once and kept resident across M tiles."""
    index_map = lambda m: (0, 0)
    # TODO(synk): drop the grid>1 guard / TypeError fallback once pl.Buffered(1) is verified
    #             on the target JAX+libtpu combo.
    if single_buffer and hasattr(pl, "Buffered"):
        try:
            return pl.BlockSpec(shape, index_map, pipeline_mode=pl.Buffered(1))
        except TypeError:
            pass
    return pl.BlockSpec(shape, index_map)


# --------------------------------------------------------------------------------------
# Fused whole-MLP kernel (small / medium models): everything resident, batch-tiled grid.
# --------------------------------------------------------------------------------------
def _fused_mlp_kernel(*refs, num_layers, activation):
    """refs = (x, w0, b0, ..., w_{L-1}, b_{L-1}, out). Whole MLP on one (TM, .) batch tile."""
    x_ref = refs[0]
    o_ref = refs[1 + 2 * num_layers]
    h = x_ref[...]  # f32 batch tile
    for i in range(num_layers):
        w = refs[1 + 2 * i][...]          # (K_i, N_i) bf16, resident
        b = refs[2 + 2 * i][...]          # (1, N_i)  f32,  resident
        h = jnp.dot(h.astype(w.dtype), w, preferred_element_type=jnp.float32) + b
        if i < num_layers - 1:
            h = _apply_activation(h, activation)
    o_ref[...] = h.astype(o_ref.dtype)


def fused_mlp(x_pad, padded_params, activation, tile_m):
    num_layers = len(padded_params)
    b_rows, in_cols = x_pad.shape
    out_cols = padded_params[-1][0].shape[1]
    assert b_rows % tile_m == 0
    num_m_tiles = b_rows // tile_m
    single_buffer = num_m_tiles > 1

    flat_args = [x_pad]
    in_specs = [pl.BlockSpec((tile_m, in_cols), lambda m: (m, 0))]
    flops = 0
    weight_bytes = 0
    max_n = 0
    for w_t, b in padded_params:
        flat_args += [w_t, b]
        in_specs += [_resident_spec(w_t.shape, single_buffer),
                     _resident_spec(b.shape, single_buffer)]
        flops += 2 * b_rows * w_t.shape[0] * w_t.shape[1]
        weight_bytes += w_t.size * w_t.dtype.itemsize + b.size * b.dtype.itemsize
        max_n = max(max_n, w_t.shape[1])

    bytes_accessed = x_pad.size * x_pad.dtype.itemsize + weight_bytes + b_rows * out_cols * 4
    working_set = (2 * tile_m * in_cols * 4 + 2 * tile_m * out_cols * 4
                   + 2 * weight_bytes + 4 * tile_m * max_n)

    kernel = functools.partial(_fused_mlp_kernel, num_layers=num_layers, activation=activation)
    return pl.pallas_call(
        kernel,
        out_shape=jax.ShapeDtypeStruct((b_rows, out_cols), jnp.float32),
        grid_spec=pltpu.PrefetchScalarGridSpec(
            num_scalar_prefetch=0,
            grid=(num_m_tiles,),
            in_specs=in_specs,
            out_specs=pl.BlockSpec((tile_m, out_cols), lambda m: (m, 0)),
        ),
        compiler_params=pltpu.CompilerParams(
            dimension_semantics=("parallel",),          # megacore-shard the batch on v7x
            vmem_limit_bytes=_vmem_limit(working_set),
        ),
        cost_estimate=pl.CostEstimate(
            flops=flops, transcendentals=0, bytes_accessed=bytes_accessed),
    )(*flat_args)


# --------------------------------------------------------------------------------------
# Per-layer (M, N, K)-tiled linear kernel (large models): VMEM accumulator, fused epilogue.
# --------------------------------------------------------------------------------------
def _tiled_linear_kernel(x_ref, w_ref, b_ref, o_ref, acc_ref, *, activation, apply_act):
    @pl.when(pl.program_id(2) == 0)
    def _():
        acc_ref[...] = jnp.zeros_like(acc_ref)

    w = w_ref[...]
    acc_ref[...] += jnp.dot(x_ref[...].astype(w.dtype), w,
                            preferred_element_type=jnp.float32)

    @pl.when(pl.program_id(2) == pl.num_programs(2) - 1)
    def _():
        h = acc_ref[...] + b_ref[...]
        if apply_act:
            h = _apply_activation(h, activation)
        o_ref[...] = h.astype(o_ref.dtype)


def _pick_tile(dim, prefer):
    for t in (prefer, 512, 256, 128):   # 256/512 fill the v6e/v7x 256-wide MXU
        if t <= dim and dim % t == 0:
            return t
    return dim


def tiled_linear(x, w_t, b, activation, apply_act, out_dtype):
    m, k = x.shape
    k2, n = w_t.shape
    assert k == k2
    tm = _pick_tile(m, 256)
    tk = _pick_tile(k, 512)
    tn = _pick_tile(n, 256)

    in_sz = x.dtype.itemsize
    w_sz = w_t.dtype.itemsize
    out_sz = jnp.dtype(out_dtype).itemsize
    working_set = (2 * (tm * tk * in_sz + tk * tn * w_sz + tn * 4)
                   + tm * tn * 4 + 2 * tm * tn * out_sz)
    bytes_accessed = m * k * in_sz + k * n * w_sz + n * 4 + m * n * out_sz

    kernel = functools.partial(_tiled_linear_kernel, activation=activation, apply_act=apply_act)
    return pl.pallas_call(
        kernel,
        out_shape=jax.ShapeDtypeStruct((m, n), out_dtype),
        grid_spec=pltpu.PrefetchScalarGridSpec(
            num_scalar_prefetch=0,
            grid=(m // tm, n // tn, k // tk),
            in_specs=[
                pl.BlockSpec((tm, tk), lambda i, j, kk: (i, kk)),
                pl.BlockSpec((tk, tn), lambda i, j, kk: (kk, j)),
                pl.BlockSpec((1, tn), lambda i, j, kk: (0, j)),
            ],
            out_specs=pl.BlockSpec((tm, tn), lambda i, j, kk: (i, j)),
            scratch_shapes=[pltpu.VMEM((tm, tn), jnp.float32)],
        ),
        compiler_params=pltpu.CompilerParams(
            dimension_semantics=("parallel", "parallel", "arbitrary"),
            vmem_limit_bytes=_vmem_limit(working_set),
        ),
        cost_estimate=pl.CostEstimate(
            flops=2 * m * k * n, transcendentals=0, bytes_accessed=bytes_accessed),
    )(x, w_t, b)


# --------------------------------------------------------------------------------------
# Wrapper mirroring PyTorchModel(input_size, output_size, hidden_layers, activation_type)
# --------------------------------------------------------------------------------------
class PallasMLP:
    def __init__(self, input_size, output_size, hidden_layers, activation_type, key,
                 force_mode=None):
        if activation_type == "LeakyReLU":
            self.activation = "leaky_relu"
        elif activation_type == "ReLU":
            self.activation = "relu"
        else:
            self.activation = "identity"

        self.input_size = int(input_size)
        self.output_size = int(output_size)
        dims = [self.input_size] + [int(h) for h in hidden_layers] + [self.output_size]

        total_padded_weight_bytes = sum(
            _round_up(dims[i], _LANE) * _round_up(dims[i + 1], _LANE) * 2
            for i in range(len(dims) - 1))
        if force_mode is not None:
            self.mode = force_mode
        else:
            self.mode = ("fused" if total_padded_weight_bytes <= _FUSED_WEIGHT_BYTES_LIMIT
                         else "tiled")

        self.params = []          # PyTorch-layout f32 (w (out,in), b (out,)) for the reference
        self.padded_params = []   # kernel-ready (w_t (K,N) bf16, b (1,N) f32)
        for i in range(len(dims) - 1):
            fan_in, fan_out = dims[i], dims[i + 1]
            key, wk, bk = jax.random.split(key, 3)
            bound = 1.0 / (fan_in ** 0.5)   # PyTorch Linear default init
            w = jax.random.uniform(wk, (fan_out, fan_in), jnp.float32, -bound, bound)
            b = jax.random.uniform(bk, (fan_out,), jnp.float32, -bound, bound)
            self.params.append((w, b))

            out_pad = _round_up(fan_out, _LANE)
            if self.mode == "fused" and i == 0:
                in_pad = fan_in            # x needs no feature padding (full-dim block)
            else:
                in_pad = _round_up(fan_in, _LANE)
            w_t_pad = jnp.zeros((in_pad, out_pad), jnp.float32)
            w_t_pad = w_t_pad.at[:fan_in, :fan_out].set(w.T).astype(jnp.bfloat16)
            b_pad = jnp.zeros((1, out_pad), jnp.float32).at[0, :fan_out].set(b)
            self.padded_params.append((w_t_pad, b_pad))

        self._forward = jax.jit(self._forward_impl)

    def _forward_impl(self, padded_params, x):
        x = x.astype(jnp.float32)
        batch = x.shape[0]
        if self.mode == "fused":
            b8 = _round_up(max(batch, _SUBLANE), _SUBLANE)
            tile_m = b8 if b8 <= 512 else 256           # pipelined 256-row tiles when large
            b_pad = _round_up(b8, tile_m)
            if b_pad != batch:
                x = jnp.pad(x, ((0, b_pad - batch), (0, 0)))
            out = fused_mlp(x, padded_params, self.activation, tile_m)
        else:
            sub = 16                                    # bf16 intermediates -> 16-row sublanes
            b16 = _round_up(max(batch, sub), sub)
            m_pad = b16 if b16 <= 512 else _round_up(b16, 256)
            k_pad0 = padded_params[0][0].shape[0]
            if m_pad == batch and k_pad0 == self.input_size:
                h = x
            else:
                h = jnp.zeros((m_pad, k_pad0), jnp.float32)
                h = h.at[:batch, : self.input_size].set(x)
            num_layers = len(padded_params)
            for i, (w_t, b) in enumerate(padded_params):
                last = i == num_layers - 1
                h = tiled_linear(h, w_t, b, self.activation, apply_act=not last,
                                 out_dtype=jnp.float32 if last else jnp.bfloat16)
            out = h
        return out[:batch, : self.output_size]

    def __call__(self, x):
        return self._forward(self.padded_params, x)

    def reference(self, x):
        """Pure-JAX reference with the same bf16-weight numerics as the kernels."""
        h = x.astype(jnp.float32)
        n = len(self.params)
        for i, (w, b) in enumerate(self.params):
            wt = w.T.astype(jnp.bfloat16)
            h = jnp.dot(h.astype(jnp.bfloat16), wt, preferred_element_type=jnp.float32) + b
            if i != n - 1:
                h = _apply_activation(h, self.activation)
        return h


if __name__ == "__main__":
    key = jax.random.PRNGKey(0)
    k_in, k_p1, k_p2, k_p3, k_in2 = jax.random.split(key, 5)

    # 1) Fused path: small DQN-style MLP.
    batch, input_size, hidden, output_size = 8, 16, [32, 32], 4
    x = jax.random.normal(k_in, (batch, input_size), jnp.float32)
    model = PallasMLP(input_size, output_size, hidden, "ReLU", k_p1)
    out = jax.block_until_ready(model(x))
    assert out.shape == (batch, output_size)
    assert jnp.allclose(out, model.reference(x), atol=1e-3, rtol=1e-3), "fused-path mismatch"

    # 2) Fused path: no hidden layers + LeakyReLU constructor path (single Linear).
    model2 = PallasMLP(16, 4, [], "LeakyReLU", k_p2)
    out2 = jax.block_until_ready(model2(x))
    assert jnp.allclose(out2, model2.reference(x), atol=1e-3, rtol=1e-3), "no-hidden mismatch"

    # 3) Per-layer (M,N,K)-tiled path (VMEM accumulator), forced on a wider MLP.
    x3 = jax.random.normal(k_in2, (64, 384), jnp.float32)
    model3 = PallasMLP(384, 128, [256], "ReLU", k_p3, force_mode="tiled")
    out3 = jax.block_until_ready(model3(x3))
    assert out3.shape == (64, 128)
    assert jnp.allclose(out3, model3.reference(x3), atol=5e-3, rtol=5e-3), "tiled-path mismatch"

    print("KERNEL_OK")
</pallas_src>

<mosaic_0001>
module attributes {stable_mosaic.version = 11 : i64} {
  func.func @_fused_mlp_kernel(%arg0: i32, %arg1: memref<8x16xf32, #tpu.memory_space<vmem>>, %arg2: memref<16x128xbf16, #tpu.memory_space<vmem>>, %arg3: memref<1x128xf32, #tpu.memory_space<vmem>>, %arg4: memref<128x128xbf16, #tpu.memory_space<vmem>>, %arg5: memref<1x128xf32, #tpu.memory_space<vmem>>, %arg6: memref<128x128xbf16, #tpu.memory_space<vmem>>, %arg7: memref<1x128xf32, #tpu.memory_space<vmem>>, %arg8: memref<8x128xf32, #tpu.memory_space<vmem>>) attributes {dimension_semantics = [#tpu.dimension_semantics<parallel>], iteration_bounds = array<i64: 1>, scalar_prefetch = 0 : i64, scratch_operands = 0 : i64, tpu.core_type = #tpu.core_type<tc>, window_params = [{transform_indices = @transform_0, window_bounds = array<i64: 8, 16>}, {pipeline_mode = #tpu.pipeline_mode<synchronous>, transform_indices = @transform_1, window_bounds = array<i64: 16, 128>}, {pipeline_mode = #tpu.pipeline_mode<synchronous>, transform_indices = @transform_2, window_bounds = array<i64: 1, 128>}, {pipeline_mode = #tpu.pipeline_mode<synchronous>, transform_indices = @transform_3, window_bounds = array<i64: 128, 128>}, {pipeline_mode = #tpu.pipeline_mode<synchronous>, transform_indices = @transform_4, window_bounds = array<i64: 1, 128>}, {pipeline_mode = #tpu.pipeline_mode<synchronous>, transform_indices = @transform_5, window_bounds = array<i64: 128, 128>}, {pipeline_mode = #tpu.pipeline_mode<synchronous>, transform_indices = @transform_6, window_bounds = array<i64: 1, 128>}, {transform_indices = @transform_7, window_bounds = array<i64: 8, 128>}]} {
    %c0 = arith.constant 0 : index
    %c0_0 = arith.constant 0 : index
    %0 = vector.load %arg1[%c0, %c0_0] : memref<8x16xf32, #tpu.memory_space<vmem>>, vector<8x16xf32>
    %c0_1 = arith.constant 0 : index
    %c0_2 = arith.constant 0 : index
    %1 = vector.load %arg2[%c0_1, %c0_2] : memref<16x128xbf16, #tpu.memory_space<vmem>>, vector<16x128xbf16>
    %c0_3 = arith.constant 0 : index
    %c0_4 = arith.constant 0 : index
    %2 = vector.load %arg3[%c0_3, %c0_4] : memref<1x128xf32, #tpu.memory_space<vmem>>, vector<1x128xf32>
    %3 = arith.truncf %0 : vector<8x16xf32> to vector<8x16xbf16>
    %cst = arith.constant dense<0.000000e+00> : vector<8x128xf32>
    %4 = tpu.matmul %3, %1, %cst {dimension_numbers = #tpu.dot_dimension_numbers<[1], [0], [0], [1], [0, 0, 1, 1], [], []>} : vector<8x16xbf16>, vector<16x128xbf16>, vector<8x128xf32> -> vector<8x128xf32>
    %5 = vector.broadcast %2 : vector<1x128xf32> to vector<8x128xf32>
    %6 = arith.addf %4, %5 : vector<8x128xf32>
    %cst_5 = arith.constant 0.000000e+00 : f32
    %7 = vector.broadcast %cst_5 : f32 to vector<8x128xf32>
    %8 = arith.maximumf %6, %7 : vector<8x128xf32>
    %c0_6 = arith.constant 0 : index
    %c0_7 = arith.constant 0 : index
    %9 = vector.load %arg4[%c0_6, %c0_7] : memref<128x128xbf16, #tpu.memory_space<vmem>>, vector<128x128xbf16>
    %c0_8 = arith.constant 0 : index
    %c0_9 = arith.constant 0 : index
    %10 = vector.load %arg5[%c0_8, %c0_9] : memref<1x128xf32, #tpu.memory_space<vmem>>, vector<1x128xf32>
    %11 = arith.truncf %8 : vector<8x128xf32> to vector<8x128xbf16>
    %cst_10 = arith.constant dense<0.000000e+00> : vector<8x128xf32>
    %12 = tpu.matmul %11, %9, %cst_10 {dimension_numbers = #tpu.dot_dimension_numbers<[1], [0], [0], [1], [0, 0, 1, 1], [], []>} : vector<8x128xbf16>, vector<128x128xbf16>, vector<8x128xf32> -> vector<8x128xf32>
    %13 = vector.broadcast %10 : vector<1x128xf32> to vector<8x128xf32>
    %14 = arith.addf %12, %13 : vector<8x128xf32>
    %cst_11 = arith.constant 0.000000e+00 : f32
    %15 = vector.broadcast %cst_11 : f32 to vector<8x128xf32>
    %16 = arith.maximumf %14, %15 : vector<8x128xf32>
    %c0_12 = arith.constant 0 : index
    %c0_13 = arith.constant 0 : index
    %17 = vector.load %arg6[%c0_12, %c0_13] : memref<128x128xbf16, #tpu.memory_space<vmem>>, vector<128x128xbf16>
    %c0_14 = arith.constant 0 : index
    %c0_15 = arith.constant 0 : index
    %18 = vector.load %arg7[%c0_14, %c0_15] : memref<1x128xf32, #tpu.memory_space<vmem>>, vector<1x128xf32>
    %19 = arith.truncf %16 : vector<8x128xf32> to vector<8x128xbf16>
    %cst_16 = arith.constant dense<0.000000e+00> : vector<8x128xf32>
    %20 = tpu.matmul %19, %17, %cst_16 {dimension_numbers = #tpu.dot_dimension_numbers<[1], [0], [0], [1], [0, 0, 1, 1], [], []>} : vector<8x128xbf16>, vector<128x128xbf16>, vector<8x128xf32> -> vector<8x128xf32>
    %21 = vector.broadcast %18 : vector<1x128xf32> to vector<8x128xf32>
    %22 = arith.addf %20, %21 : vector<8x128xf32>
    %c0_17 = arith.constant 0 : index
    %c0_18 = arith.constant 0 : index
    %23 = vector.load %arg8[%c0_17, %c0_18] : memref<8x128xf32, #tpu.memory_space<vmem>>, vector<8x128xf32>
    tpu.vector_store %arg8[%c0_17, %c0_18], %22 {strides = array<i32>} : memref<8x128xf32, #tpu.memory_space<vmem>>, vector<8x128xf32>,
    return
  }
  func.func @transform_0(%arg0: i32) -> (i32, i32) {
    %c0_i32 = arith.constant 0 : i32
    %c0_i32_0 = arith.constant 0 : i32
    return %arg0, %c0_i32 : i32, i32
  }
  func.func @transform_1(%arg0: i32) -> (i32, i32) {
    %c0_i32 = arith.constant 0 : i32
    %c0_i32_0 = arith.constant 0 : i32
    %c0_i32_1 = arith.constant 0 : i32
    return %c0_i32, %c0_i32_0 : i32, i32
  }
  func.func @transform_2(%arg0: i32) -> (i32, i32) {
    %c0_i32 = arith.constant 0 : i32
    %c0_i32_0 = arith.constant 0 : i32
    %c0_i32_1 = arith.constant 0 : i32
    return %c0_i32, %c0_i32_0 : i32, i32
  }
  func.func @transform_3(%arg0: i32) -> (i32, i32) {
    %c0_i32 = arith.constant 0 : i32
    %c0_i32_0 = arith.constant 0 : i32
    %c0_i32_1 = arith.constant 0 : i32
    return %c0_i32, %c0_i32_0 : i32, i32
  }
  func.func @transform_4(%arg0: i32) -> (i32, i32) {
    %c0_i32 = arith.constant 0 : i32
    %c0_i32_0 = arith.constant 0 : i32
    %c0_i32_1 = arith.constant 0 : i32
    return %c0_i32, %c0_i32_0 : i32, i32
  }
  func.func @transform_5(%arg0: i32) -> (i32, i32) {
    %c0_i32 = arith.constant 0 : i32
    %c0_i32_0 = arith.constant 0 : i32
    %c0_i32_1 = arith.constant 0 : i32
    return %c0_i32, %c0_i32_0 : i32, i32
  }
  func.func @transform_6(%arg0: i32) -> (i32, i32) {
    %c0_i32 = arith.constant 0 : i32
    %c0_i32_0 = arith.constant 0 : i32
    %c0_i32_1 = arith.constant 0 : i32
    return %c0_i32, %c0_i32_0 : i32, i32
  }
  func.func @transform_7(%arg0: i32) -> (i32, i32) {
    %c0_i32 = arith.constant 0 : i32
    %c0_i32_0 = arith.constant 0 : i32
    return %arg0, %c0_i32 : i32, i32
  }
}

</mosaic_0001>

<bundles_post_ra>
// kernel: _forward_impl.1
= control target key start
LH: loop header
LB: loop body
LE: loop exit
PB: predicated region body
PF: predicated region fallthrough
CT: control target
= control target key end

     0   :  { %12 = vsyncpa [#allocation3], 0  ;;  %s677_s0 = inlined_call_operand.vmem [shape: f32[8,16], index: 0, kind: input, shape index: {}]   ;;  %s678_s1 = inlined_call_operand.hbm [shape: bf16[16,128], index: 1, kind: input, shape index: {}]   ;;  %s679_s2 = inlined_call_operand.vmem [shape: f32[1,128], index: 2, kind: input, shape index: {}]   ;;  %s680_s3 = inlined_call_operand.hbm [shape: bf16[128,128], index: 3, kind: input, shape index: {}]   ;;  %s681_s4 = inlined_call_operand.vmem [shape: f32[1,128], index: 4, kind: input, shape index: {}]   ;;  %s682_s5 = inlined_call_operand.hbm [shape: bf16[128,128], index: 5, kind: input, shape index: {}]   ;;  %s683_s6 = inlined_call_operand.vmem [shape: f32[1,128], index: 6, kind: input, shape index: {}]   ;;  %s684_s7 = inlined_call_operand.vmem [shape: f32[8,128], index: 7, kind: output, shape index: {}]  }
   0x1   :  { %13 = vsyncpa [#allocation5], 0  ;;  %s543_s24 = smov [#allocation4]   ;;  %s544_s26 = smov [#allocation2]  }
   0x2   :  { %s35_s25 = sshll.u32 %s543_s24, 4  ;;  %s21_s27 = sshll.u32 %s544_s26, 4  ;;  %s36_s25 = int_to_ptr.vmem [resolvable:$true] %s35_s25  ;;  %s590_s27 = int_to_ptr.vmem [resolvable:$true] %s21_s27 }
   0x3   :  { %s473_s30 = scalar_lea.hbm %s680_s3, 1024 }
   0x4   :  { %p474_p0 = scmp.ne.s32.totalorder %s680_s3, %s473_s30  ;;  %p477_p1 = scmp.lt.u32.totalorder %s473_s30, %s680_s3 }
   0x6   :  { %p479_p2 = pnand %p477_p1, %p474_p0 }
   0x8   :  { %482 = shalt.err (!%p479_p2)
}
   0x9   :  { %s483_s12 = scalar_lea.vmem %s36_s25, 1024  ;;  %p488_p4 = scmp.lt.s32.totalorder %s36_s25, %s36_s25 }
   0xa   :  { %p484_p3 = scmp.ne.s32.totalorder %s36_s25, %s483_s12  ;;  %p489_p5 = scmp.lt.s32.totalorder %s483_s12, %s483_s12 }
   0xc   :  { %p490_p6 = por %p489_p5, %p488_p4 }
   0xe   :  { %p491_p7 = pnand %p490_p6, %p484_p3 }
  0x10   :  { %494 = shalt.err (!%p491_p7)
}
  0x11   :  { %s545_s13 = smov 64   ;;  %s546_s14 = smov 4  }
  0x12   :  { %41 = dma.hbm_to_vmem [thread:$0]  %s680_s3, 1024, %s36_s25, [#allocation5], %s545_s13, %s545_s13, %s546_s14  }
  0x13   :  { %s495_s19 = scalar_lea.hbm %s678_s1, 128 }
  0x14   :  { %p496_p8 = scmp.ne.s32.totalorder %s678_s1, %s495_s19  ;;  %p499_p9 = scmp.lt.u32.totalorder %s495_s19, %s678_s1 }
  0x16   :  { %p501_p10 = pnand %p499_p9, %p496_p8 }
  0x18   :  { %504 = shalt.err (!%p501_p10)
}
  0x19   :  { %s505_s24 = scalar_lea.vmem %s590_s27, 128  ;;  %p510_p12 = scmp.lt.s32.totalorder %s590_s27, %s590_s27 }
  0x1a   :  { %p506_p11 = scmp.ne.s32.totalorder %s590_s27, %s505_s24  ;;  %p511_p13 = scmp.lt.s32.totalorder %s505_s24, %s505_s24 }
  0x1c   :  { %p512_p0 = por %p511_p13, %p510_p12 }
  0x1e   :  { %p513_p1 = pnand %p512_p0, %p506_p11 }
  0x20   :  { %516 = shalt.err (!%p513_p1)
}
  0x21   :  { %27 = dma.hbm_to_vmem [thread:$0]  %s678_s1, 128, %s590_s27, [#allocation3], %s545_s13, %s545_s13, %s546_s14  }
  0x22   :  { %s547_s26 = smov [#allocation6]   ;;  %s517_s8 = scalar_lea.hbm %s682_s5, 1024 }
  0x23   :  { %s49_s28 = sshll.u32 %s547_s26, 4  ;;  %p518_p2 = scmp.ne.s32.totalorder %s682_s5, %s517_s8  ;;  %s50_s28 = int_to_ptr.vmem [resolvable:$true] %s49_s28 }
  0x24   :  { %p521_p3 = scmp.lt.u32.totalorder %s517_s8, %s682_s5 }
  0x26   :  { %p523_p4 = pnand %p521_p3, %p518_p2 }
  0x28   :  { %526 = shalt.err (!%p523_p4)
}
  0x29   :  { %s527_s15 = scalar_lea.vmem %s50_s28, 1024  ;;  %p532_p6 = scmp.lt.s32.totalorder %s50_s28, %s50_s28 }
  0x2a   :  { %p528_p5 = scmp.ne.s32.totalorder %s50_s28, %s527_s15  ;;  %p533_p7 = scmp.lt.s32.totalorder %s527_s15, %s527_s15 }
  0x2c   :  { %p534_p8 = por %p533_p7, %p532_p6 }
  0x2e   :  { %p535_p9 = pnand %p534_p8, %p528_p5 }
  0x30   :  { %538 = shalt.err (!%p535_p9)
}
  0x31   :  { %55 = dma.hbm_to_vmem [thread:$0]  %s682_s5, 1024, %s50_s28, [#allocation5], %s545_s13, %s545_s13, %s546_s14  }
  0x32   :  { %539 = dma.done.wait [#allocation3], 128  }
  0x33   :  { %540 = vsyncadd [#allocation3], 4294967168 }
  0x34   :  { %541 = dma.done.wait [#allocation5], 2048  }
  0x35   :  { %542 = vsyncadd [#allocation5], 4294965248  ;;  %v548_v0 = vmov 0.0   ;;  %vm549_vm0 = vmmov 0   ;;  %v456_v1 = vld [vmem:[#allocation2] sm:$0xff]   ;;  %v68_v2 = vld [vmem:[%s677_s0] sm:$0xff] }
  0x36   :  { %403 = vmatprep.subr.bf16.mxu0 %v548_v0  ;;  %405 = vmatprep.mubr.msk.bf16.mxu0 %vm549_vm0, %v548_v0  ;;  %v72_v3 = vpack.c.bf16 %v68_v2, %v68_v2  ;;  %vm85_vm1 = vcmask 130048   ;;  %v457_v4 = vld [vmem:[#allocation4] sm:$0xff]   ;;  %v458_v5 = vld [vmem:[#allocation4 + $0x8] sm:$0xff]   ;;  %v459_v6 = vld [vmem:[#allocation4 + $0x10] sm:$0xff]  }
  0x37   :  { %409 = vmatprep.subr.bf16.mxu1 %v548_v0  ;;  %425 = vmatprep.mubr.msk.bf16.mxu1 %vm549_vm0, %v548_v0  ;;  %v460_v7 = vld [vmem:[#allocation4 + $0x18] sm:$0xff]   ;;  %v461_v8 = vld [vmem:[#allocation4 + $0x20] sm:$0xff]   ;;  %v462_v9 = vld [vmem:[#allocation4 + $0x28] sm:$0xff]  }
  0x38   :  { %404 = vmatpush3.bf16.msra.mxu0 %v456_v1  ;;  %410 = vmatpush3.bf16.msra.mxu1 %v457_v4  ;;  %v463_v10 = vld [vmem:[#allocation4 + $0x30] sm:$0xff]   ;;  %v464_v11 = vld [vmem:[#allocation4 + $0x38] sm:$0xff]   ;;  %v465_v12 = vld [vmem:[#allocation6] sm:$0xff]  }
  0x39   :  { %429 = vmatprep.subr.bf16.mxu0 %v548_v0  ;;  %411 = vmatprep.subr.bf16.mxu1 %v548_v0  ;;  %v466_v13 = vld [vmem:[#allocation6 + $0x8] sm:$0xff]   ;;  %v467_v14 = vld [vmem:[#allocation6 + $0x10] sm:$0xff]   ;;  %v468_v15 = vld [vmem:[#allocation6 + $0x18] sm:$0xff]  }
  0x3a   :  { %v469_v16 = vld [vmem:[#allocation6 + $0x20] sm:$0xff]   ;;  %v470_v17 = vld [vmem:[#allocation6 + $0x28] sm:$0xff]   ;;  %v362_v18 = vld [vmem:[%s679_s2] ss:$0 sm:$0xff] }
  0x3b   :  { %406 = vmatmul.mubr.msk.bf16.vlgmr.msra.gmra.mrb[0].mxu0 %vm85_vm1, %v72_v3  ;;  %v471_v26 = vld [vmem:[#allocation6 + $0x30] sm:$0xff]   ;;  %v472_v27 = vld [vmem:[#allocation6 + $0x38] sm:$0xff]  }
  0x3c   :  { %445 = vmatprep.mubr.msk.bf16.mxu0 %vm549_vm0, %v548_v0  ;;  %412 = vmatpush3.bf16.msra.mxu1 %v458_v5  ;;  %v365_v28 = vld [vmem:[%s681_s4] ss:$0 sm:$0xff] }
  0x3d   :  { %413 = vmatprep.subr.bf16.mxu1 %v548_v0  ;;  %430 = vmatpush3.bf16.msra.mxu0 %v465_v12  ;;  %v374_v36 = vld [vmem:[%s683_s6] ss:$0 sm:$0xff] }
  0x3e   :  { %431 = vmatprep.subr.bf16.mxu0 %v548_v0 }
  0x40   :  { %414 = vmatpush3.bf16.msra.mxu1 %v459_v6 }
  0x41   :  { %415 = vmatprep.subr.bf16.mxu1 %v548_v0  ;;  %432 = vmatpush3.bf16.msra.mxu0 %v466_v13 }
  0x42   :  { %433 = vmatprep.subr.bf16.mxu0 %v548_v0 }
  0x44   :  { %416 = vmatpush3.bf16.msra.mxu1 %v460_v7 }
  0x45   :  { %417 = vmatprep.subr.bf16.mxu1 %v548_v0  ;;  %434 = vmatpush3.bf16.msra.mxu0 %v467_v14 }
  0x46   :  { %435 = vmatprep.subr.bf16.mxu0 %v548_v0 }
  0x48   :  { %418 = vmatpush3.bf16.msra.mxu1 %v461_v8 }
  0x49   :  { %419 = vmatprep.subr.bf16.mxu1 %v548_v0  ;;  %436 = vmatpush3.bf16.msra.mxu0 %v468_v15 }
  0x4a   :  { %437 = vmatprep.subr.bf16.mxu0 %v548_v0 }
  0x4c   :  { %420 = vmatpush3.bf16.msra.mxu1 %v462_v9 }
  0x4d   :  { %421 = vmatprep.subr.bf16.mxu1 %v548_v0  ;;  %438 = vmatpush3.bf16.msra.mxu0 %v469_v16 }
  0x4e   :  { %439 = vmatprep.subr.bf16.mxu0 %v548_v0 }
  0x50   :  { %422 = vmatpush3.bf16.msra.mxu1 %v463_v10 }
  0x51   :  { %423 = vmatprep.subr.bf16.mxu1 %v548_v0  ;;  %440 = vmatpush3.bf16.msra.mxu0 %v470_v17 }
  0x52   :  { %441 = vmatprep.subr.bf16.mxu0 %v548_v0 }
  0x54   :  { %424 = vmatpush3.bf16.msra.mxu1 %v464_v11 }
  0x55   :  { %442 = vmatpush3.bf16.msra.mxu0 %v471_v26 }
  0x56   :  { %443 = vmatprep.subr.bf16.mxu0 %v548_v0 }
  0x59   :  { %444 = vmatpush3.bf16.msra.mxu0 %v472_v27 }
 0x10e   :  { %v123_v19 = vpop.f32.mrb[0].mxu0 }
 0x10f   :  { %v124_v20 = vadd.f32 %v362_v18, %v123_v19  ;;  %v407_v21 = vpop.f32.mrb[1].mxu0 }
 0x110   :  { %v126_v22 = vpop.f32.mrb[2].mxu0 }
 0x111   :  { %v129_v23 = vmax.f32 %v124_v20, 0.0  ;;  %v408_v24 = vpop.f32.mrb[3].mxu0 }
 0x113   :  { %v147_v25 = vpack.c.bf16 %v129_v23, %v129_v23 }
 0x115   :  { %426 = vmatmul.mubr.bf16.vlgmr.msra.gmra.mrb[0].mxu1 %v147_v25 }
 0x1e8   :  { %v236_v29 = vpop.f32.mrb[0].mxu1 }
 0x1e9   :  { %v237_v30 = vadd.f32 %v365_v28, %v236_v29  ;;  %v427_v31 = vpop.f32.mrb[1].mxu1 }
 0x1ea   :  { %v239_v32 = vpop.f32.mrb[2].mxu1 }
 0x1eb   :  { %v242_v33 = vmax.f32 %v237_v30, 0.0  ;;  %v428_v34 = vpop.f32.mrb[3].mxu1 }
 0x1ed   :  { %v260_v35 = vpack.c.bf16 %v242_v33, %v242_v33 }
 0x1ef   :  { %446 = vmatmul.mubr.bf16.vlgmr.msra.gmra.mrb[4].mxu0 %v260_v35 }
 0x2c2   :  { %v349_v37 = vpop.f32.mrb[4].mxu0 }
 0x2c3   :  { %v350_v38 = vadd.f32 %v374_v36, %v349_v37  ;;  %v447_v39 = vpop.f32.mrb[5].mxu0 }
 0x2c4   :  { %v352_v40 = vpop.f32.mrb[6].mxu0 }
 0x2c5   :  { %355 = vst [vmem:[%s684_s7] sm:$0xff] %v350_v38  ;;  %v448_v41 = vpop.f32.mrb[7].mxu0 }
 0x2c6   :  { %360 = vsyncpa [#allocation3], 1 }
 0x2c7   :  { %361 = vsyncpa [#allocation5], 1 }

</bundles_post_ra>
